<compile_context>
chip_gen: v5e
topology: v5e:2x2
jax: 0.10.0
libtpu: 0.0.40
codegen_flags: <defaults>
</compile_context>

<pallas_src>
import numpy as np
import jax
import jax.numpy as jnp
from jax.experimental import pallas as pl
from jax.experimental.pallas import tpu as pltpu

_LANE = 128     # TPU vreg lane width (last dim)
_SUBLANE = 8    # f32 sublane width (second-last dim)


def _cnnkf_matmul_kernel(ctx_ref, w_ref, out_ref):
    # ctx_ref: [tm, K]      one M-tile of flattened context (flip folded into weight)
    # w_ref:   [K, N_pad]   pre-permuted, contiguously window-packed, tail-padded IR
    # out_ref: [tm, N_pad]  lane-dense f32 output tile
    ctx = ctx_ref[...].astype(w_ref.dtype)   # in-kernel cast (f32 no-op / bf16 path)
    out_ref[...] = jnp.dot(
        ctx, w_ref[...], preferred_element_type=jnp.float32
    ).astype(out_ref.dtype)


def prepare_observation_IR(observation_IR: jax.Array, L: int,
                           dtype=jnp.float32) -> jax.Array:
    """Fold conv2d's flip + permute + window shifts + tail padding into one weight.

    Runs once per parameter value (off the forward hot path).  Returns W of shape
    [L*O_D, ceil(H_out*O_D_out/128)*128] with
      W[l*O_D + c, i*O_D_out + j] = observation_IR[c, i + L - 1 - l, j]
    (windows packed contiguously along the lane axis; only the tail is zero-padded).
    Pass dtype=jnp.bfloat16 on v6e/v7x to halve weight bytes (f32 accumulation kept).
    """
    O_D, R, O_D_out = observation_IR.shape
    assert L <= R
    H_out = R - L + 1
    K = L * O_D
    N = H_out * O_D_out
    N_pad = pl.cdiv(N, _LANE) * _LANE
    cols = []
    for i in range(H_out):
        w_i = observation_IR[:, i: i + L, :]       # [c, t, j], t = i .. i+L-1
        w_i = jnp.flip(w_i, axis=1)                # [c, l, j] = IR[c, i+L-1-l, j]
        w_i = jnp.transpose(w_i, (1, 0, 2))        # [l, c, j]
        cols.append(w_i.reshape(K, O_D_out))       # [K, O_D_out]
    W = jnp.concatenate(cols, axis=1)              # [K, H_out*O_D_out] (contiguous)
    W = jnp.pad(W, ((0, 0), (0, N_pad - N)))       # pad only the tail to 128
    return W.astype(dtype)


def cnnkf_forward_prepared(prepared_w: jax.Array, context: jax.Array,
                           O_D_out: int, H_out: int, *,
                           block_b: int = 128) -> jax.Array:
    """Hot-path forward: one pallas_call matmul tiled over the batch.

    context: [B, L, O_D]  ->  returns [B, H_out, O_D_out].
    """
    B, L, O_D = context.shape
    K = L * O_D
    N = H_out * O_D_out
    N_pad = prepared_w.shape[1]
    assert prepared_w.shape[0] == K
    assert N <= N_pad < N + _LANE, "weight packing layout mismatch"

    # Flatten (L, O_D) -> K (the conv time flip lives in the weight).  The dtype cast
    # happens inside the kernel, so this is the only wrapper-side op before the call.
    ctx_flat = context.reshape(B, K)

    # Pad B to a sublane multiple and pick the M tile (multiple of 8, <= block_b).
    B8 = pl.cdiv(B, _SUBLANE) * _SUBLANE
    tm = min(B8, pl.cdiv(block_b, _SUBLANE) * _SUBLANE)
    B_pad = pl.cdiv(B8, tm) * tm
    grid_m = B_pad // tm
    if B_pad != B:
        ctx_flat = jnp.pad(ctx_flat, ((0, B_pad - B), (0, 0)))

    ctx_bytes = jnp.dtype(ctx_flat.dtype).itemsize
    w_bytes = jnp.dtype(prepared_w.dtype).itemsize
    # 2x double-buffered ctx/out tiles + (double-buffer-counted) weight, + headroom.
    needed = 2 * (tm * K * ctx_bytes + tm * N_pad * 4) + 2 * K * N_pad * w_bytes
    vmem_limit = int(min(max(2 * needed, 4 << 20), 64 << 20))

    out_padded = pl.pallas_call(
        _cnnkf_matmul_kernel,
        out_shape=jax.ShapeDtypeStruct((B_pad, N_pad), jnp.float32),
        grid_spec=pltpu.PrefetchScalarGridSpec(
            num_scalar_prefetch=0,
            grid=(grid_m,),
            in_specs=[
                pl.BlockSpec((tm, K), lambda i: (i, 0)),       # ctx tile per grid step
                pl.BlockSpec((K, N_pad), lambda i: (0, 0)),    # weight resident (const map)
            ],
            out_specs=pl.BlockSpec((tm, N_pad), lambda i: (i, 0)),
        ),
        compiler_params=pltpu.CompilerParams(
            dimension_semantics=("parallel",),
            vmem_limit_bytes=vmem_limit,
        ),
        cost_estimate=pl.CostEstimate(
            flops=2 * B_pad * K * N_pad,
            transcendentals=0,
            bytes_accessed=B_pad * K * ctx_bytes + K * N_pad * w_bytes + B_pad * N_pad * 4,
        ),
    )(ctx_flat, prepared_w)

    # Single tail slice (drops B padding + lane padding) + metadata-only reshape.
    out = out_padded[:B, :N].reshape(B, H_out, O_D_out)
    # NOTE: intentional downcast of the f32 accumulator when context is lower precision.
    return out.astype(context.dtype)


def cnnkf_forward(observation_IR: jax.Array, context: jax.Array,
                  weight_dtype=jnp.float32) -> jax.Array:
    """Convenience wrapper (prepare + run).  In a training/inference loop, call
    prepare_observation_IR once per parameter update and reuse the result."""
    O_D, R, O_D_out = observation_IR.shape
    B, L, O_D_ctx = context.shape
    assert O_D_ctx == O_D and L <= R
    H_out = R - L + 1
    w = prepare_observation_IR(observation_IR, L, dtype=weight_dtype)
    return cnnkf_forward_prepared(w, context, O_D_out, H_out)


def cnnkf_forward_reference(observation_IR: jax.Array, context: jax.Array) -> jax.Array:
    """Plain-JAX reference of the conv2d forward semantics (for validation)."""
    O_D, R, O_D_out = observation_IR.shape
    B, L, _ = context.shape
    H_out = R - L + 1
    ctx_flip = jnp.flip(context, axis=1)              # [B, L, O_D]
    rows = []
    for i in range(H_out):
        ir_slice = observation_IR[:, i: i + L, :]     # [O_D, L, O_D]
        rows.append(jnp.einsum("blc,clj->bj", ctx_flip, ir_slice))
    return jnp.stack(rows, axis=1)                    # [B, H_out, O_D]


if __name__ == "__main__":
    # Shapes consistent with the module: ny (O_D) = 4, ir_length = 8, batch = 2.
    O_D = 4
    ir_length = 8
    B = 2

    key = jax.random.PRNGKey(0)
    k_ir, k_ctx = jax.random.split(key)
    # Module __init__ zeros observation_IR; use deterministic random values of the same
    # shape so the kernel output is non-trivial.
    observation_IR = jax.random.normal(k_ir, (O_D, ir_length, O_D), dtype=jnp.float32)

    # Case 1: intended use, L == ir_length -> H_out == 1 (output [B, 1, O_D]).
    L1 = ir_length
    context1 = jax.random.normal(k_ctx, (B, L1, O_D), dtype=jnp.float32)
    w1 = prepare_observation_IR(observation_IR, L1)            # cached off hot path
    out1 = jax.block_until_ready(
        cnnkf_forward_prepared(w1, context1, O_D, ir_length - L1 + 1))
    ref1 = cnnkf_forward_reference(observation_IR, context1)
    assert out1.shape == (B, ir_length - L1 + 1, O_D), out1.shape
    np.testing.assert_allclose(np.asarray(out1), np.asarray(ref1), rtol=1e-5, atol=1e-5)

    # Case 2: shorter context, L < ir_length -> H_out > 1 exercises the contiguously
    # window-packed weight (single tail pad, no per-window 128-lane padding).
    L2 = 6
    context2 = jax.random.normal(jax.random.PRNGKey(1), (B, L2, O_D), dtype=jnp.float32)
    out2 = jax.block_until_ready(cnnkf_forward(observation_IR, context2))
    ref2 = cnnkf_forward_reference(observation_IR, context2)
    assert out2.shape == (B, ir_length - L2 + 1, O_D), out2.shape
    np.testing.assert_allclose(np.asarray(out2), np.asarray(ref2), rtol=1e-5, atol=1e-5)

    # Case 3: large batch exercises the B-grid ("parallel"), sublane padding and the
    # VMEM-resident weight across grid steps.
    B3 = 300
    context3 = jax.random.normal(jax.random.PRNGKey(2), (B3, L2, O_D), dtype=jnp.float32)
    w3 = prepare_observation_IR(observation_IR, L2)
    out3 = jax.block_until_ready(
        cnnkf_forward_prepared(w3, context3, O_D, ir_length - L2 + 1))
    ref3 = cnnkf_forward_reference(observation_IR, context3)
    assert out3.shape == (B3, ir_length - L2 + 1, O_D), out3.shape
    np.testing.assert_allclose(np.asarray(out3), np.asarray(ref3), rtol=1e-5, atol=1e-5)

    # Case 4: bf16 weight path (halved weight DMA, bf16 MXU, f32 accumulation).
    w4 = prepare_observation_IR(observation_IR, L2, dtype=jnp.bfloat16)
    out4 = jax.block_until_ready(
        cnnkf_forward_prepared(w4, context2, O_D, ir_length - L2 + 1))
    np.testing.assert_allclose(np.asarray(out4), np.asarray(ref2), rtol=2e-2, atol=2e-2)

    # TODO(synk): analytical_error / update (eig, inv, pinv, matrix_rank) are host-side
    # linear algebra with no clean Pallas equivalent and are not part of forward().
    print("KERNEL_OK")
</pallas_src>

<mosaic_0001>
module attributes {stable_mosaic.version = 11 : i64} {
  func.func @_cnnkf_matmul_kernel(%arg0: i32, %arg1: memref<8x32xf32, #tpu.memory_space<vmem>>, %arg2: memref<32x128xf32, #tpu.memory_space<vmem>>, %arg3: memref<8x128xf32, #tpu.memory_space<vmem>>) attributes {dimension_semantics = [#tpu.dimension_semantics<parallel>], iteration_bounds = array<i64: 1>, scalar_prefetch = 0 : i64, scratch_operands = 0 : i64, tpu.core_type = #tpu.core_type<tc>, window_params = [{transform_indices = @transform_0, window_bounds = array<i64: 8, 32>}, {pipeline_mode = #tpu.pipeline_mode<synchronous>, transform_indices = @transform_1, window_bounds = array<i64: 32, 128>}, {transform_indices = @transform_2, window_bounds = array<i64: 8, 128>}]} {
    %c0 = arith.constant 0 : index
    %c0_0 = arith.constant 0 : index
    %0 = vector.load %arg1[%c0, %c0_0] : memref<8x32xf32, #tpu.memory_space<vmem>>, vector<8x32xf32>
    %c0_1 = arith.constant 0 : index
    %c0_2 = arith.constant 0 : index
    %1 = vector.load %arg2[%c0_1, %c0_2] : memref<32x128xf32, #tpu.memory_space<vmem>>, vector<32x128xf32>
    %cst = arith.constant dense<0.000000e+00> : vector<8x128xf32>
    %2 = tpu.matmul %0, %1, %cst {dimension_numbers = #tpu.dot_dimension_numbers<[1], [0], [0], [1], [0, 0, 1, 1], [], []>} : vector<8x32xf32>, vector<32x128xf32>, vector<8x128xf32> -> vector<8x128xf32>
    %c0_3 = arith.constant 0 : index
    %c0_4 = arith.constant 0 : index
    %3 = vector.load %arg3[%c0_3, %c0_4] : memref<8x128xf32, #tpu.memory_space<vmem>>, vector<8x128xf32>
    tpu.vector_store %arg3[%c0_3, %c0_4], %2 {strides = array<i32>} : memref<8x128xf32, #tpu.memory_space<vmem>>, vector<8x128xf32>,
    return
  }
  func.func @transform_0(%arg0: i32) -> (i32, i32) {
    %c0_i32 = arith.constant 0 : i32
    %c0_i32_0 = arith.constant 0 : i32
    return %arg0, %c0_i32 : i32, i32
  }
  func.func @transform_1(%arg0: i32) -> (i32, i32) {
    %c0_i32 = arith.constant 0 : i32
    %c0_i32_0 = arith.constant 0 : i32
    %c0_i32_1 = arith.constant 0 : i32
    return %c0_i32, %c0_i32_0 : i32, i32
  }
  func.func @transform_2(%arg0: i32) -> (i32, i32) {
    %c0_i32 = arith.constant 0 : i32
    %c0_i32_0 = arith.constant 0 : i32
    return %arg0, %c0_i32 : i32, i32
  }
}

</mosaic_0001>

<bundles_post_ra>
// kernel: tpu_custom_call.1
= control target key start
LH: loop header
LB: loop body
LE: loop exit
PB: predicated region body
PF: predicated region fallthrough
CT: control target
= control target key end

     0   :  { %7 = vsyncpa [#allocation3], 0  ;;  %s203_s0 = inlined_call_operand.hbm [shape: f32[8,32], index: 0, kind: input, shape index: {}]   ;;  %s204_s1 = inlined_call_operand.hbm [shape: f32[32,128], index: 1, kind: input, shape index: {}]   ;;  %s205_s2 = inlined_call_operand.hbm [shape: f32[8,128], index: 2, kind: output, shape index: {}]  }
   0x1   :  { %8 = vsyncpa [#allocation6], 0 }
   0x2   :  { %9 = vsyncpa [#allocation4], 0  ;;  %s15_s11 = sshll.u32 %s203_s0, 4  ;;  %s174_s12 = smov [#allocation2]   ;;  %s16_s11 = int_to_ptr.hbm [resolvable:$true] %s15_s11 }
   0x3   :  { %s17_s13 = sshll.u32 %s174_s12, 4  ;;  %s25_s16 = sshll.u32 %s204_s1, 4  ;;  %s18_s13 = int_to_ptr.vmem [resolvable:$true] %s17_s13  ;;  %s26_s16 = int_to_ptr.hbm [resolvable:$true] %s25_s16 }
   0x4   :  { %20 = dma.hbm_to_vmem [thread:$0]  %s16_s11, 128, %s18_s13, [#allocation3]  }
   0x5   :  { %s175_s17 = smov [#allocation5]   ;;  %s176_s19 = smov 128  }
   0x6   :  { %s27_s18 = sshll.u32 %s175_s17, 4  ;;  %s177_s20 = smov 8   ;;  %s28_s18 = int_to_ptr.vmem [resolvable:$true] %s27_s18 }
   0x7   :  { %33 = dma.hbm_to_vmem [thread:$0]  %s26_s16, 512, %s28_s18, [#allocation6], %s176_s19, %s176_s19, %s177_s20  }
   0x8   :  { %168 = dma.done.wait [#allocation3], 128  }
   0x9   :  { %169 = vsyncadd [#allocation3], 4294967168 }
   0xa   :  { %170 = dma.done.wait [#allocation6], 512  }
   0xb   :  { %171 = vsyncadd [#allocation6], 4294966784  ;;  %v46_v0 = vld [vmem:[#allocation5 + $0x18] sm:$0xff]  ;;  %v45_v1 = vld [vmem:[#allocation5 + $0x10] sm:$0xff]  ;;  %vm47_vm0 = vcmask 261120   ;;  %s178_s0 = smov [#allocation7]  }
   0xc   :  { %63 = vmatpush.msra.mxu0 %v46_v0  ;;  %v44_v2 = vld [vmem:[#allocation5 + $0x8] sm:$0xff]  ;;  %v43_v3 = vld [vmem:[#allocation5] sm:$0xff]  ;;  %v42_v4 = vld [vmem:[#allocation2] sm:$0xff]  ;;  %s77_s1 = sshll.u32 %s178_s0, 4  ;;  %s79_s23 = sshll.u32 %s205_s2, 4  ;;  %s78_s1 = int_to_ptr.vmem [resolvable:$true] %s77_s1  ;;  %s80_s23 = int_to_ptr.hbm [resolvable:$true] %s79_s23 }
   0xe   :  { %64 = vmatpush.msra.mxu0 %v45_v1 }
  0x10   :  { %65 = vmatpush.msra.mxu0 %v44_v2 }
  0x12   :  { %66 = vmatpush.msra.mxu0 %v43_v3 }
  0x13   :  { %90 = vmatmul.msk.f32.vlgmr.msra.gmra.mxu0 %vm47_vm0, %v42_v4 }
  0x90   :  { %v68_v5 = vpop.f32.mrf.mxu0 }
  0x91   :  { %71 = vst [vmem:[#allocation7] sm:$0xff] %v68_v5 }
  0x92   :  { %82 = dma.vmem_to_hbm [thread:$0]  %s78_s1, 128, %s80_s23, [#allocation4]  }
  0x93   :  { %172 = dma.done.wait [#allocation4], 128  }
  0x94   :  { %173 = vsyncadd [#allocation4], 4294967168 }
  0x95   :  { %87 = vsyncpa [#allocation3], 1 }
  0x96   :  { %88 = vsyncpa [#allocation6], 1 }
  0x97   :  { %89 = vsyncpa [#allocation4], 1 }

</bundles_post_ra>
